<compile_context>
chip_gen: v5e
topology: v5e:2x2
jax: 0.10.0
libtpu: 0.0.40
codegen_flags: <defaults>
</compile_context>

<pallas_src>
import functools

import jax
import jax.numpy as jnp
from jax.experimental import pallas as pl
from jax.experimental.pallas import tpu as pltpu


def _elr_row_kernel(idx_ref, logits_ref, ema_ref, new_ema_ref, term_ref, *, beta):
    # Row selection is done entirely by the BlockSpec index_maps.
    del idx_ref

    x = logits_ref[...].astype(jnp.float32)       # (1, 1, C) logits for this sample
    ema_row = ema_ref[...].astype(jnp.float32)    # (1, 1, C) old ema[index[i]]

    # Numerically-stable softmax over the class (lane) dim.
    m = jnp.max(x, axis=-1, keepdims=True)
    e = jnp.exp(x - m)
    y_pred = e / jnp.sum(e, axis=-1, keepdims=True)
    y_pred = jnp.clip(y_pred, 0.0001, 1.0 - 0.0001)

    # Detached, re-normalized distribution (identical values in the forward pass).
    y_norm = y_pred / jnp.sum(y_pred, axis=-1, keepdims=True)
    # NOTE: pl.reciprocal(..., approx=True) would move these divides to the EUP,
    # but it perturbs the persistent EMA state; exact divides keep bit-fidelity.
    # TODO(synk): for very large C (>=512) the three row-sums could be offloaded
    # to the MXU via a ones-vector dot to relieve the XLU.

    new_row = beta * ema_row + (1.0 - beta) * y_norm
    new_ema_ref[...] = new_row.astype(new_ema_ref.dtype)

    inner = jnp.sum(new_row * y_pred, axis=-1, keepdims=True)     # (1, 1, 1)
    term_ref[...] = jnp.log(1.0 - inner).astype(term_ref.dtype)   # per-row partial


def elr_loss_forward(ema, index, outputs, *, beta, lamb):
    """Functional ELR forward.  Returns (new_ema, final_loss)."""
    num, cls = ema.shape
    B, C = outputs.shape
    assert C == cls, "class dims must match"
    index = index.astype(jnp.int32)

    # Free (layout-preserving) reshapes so every BlockSpec's last two dims equal
    # the full array dims: one lane-major row per grid step.
    ema3 = ema.reshape(num, 1, cls)          # f32 state table
    logits3 = outputs.reshape(B, 1, C)       # native dtype, upcast in kernel

    grid_spec = pltpu.PrefetchScalarGridSpec(
        num_scalar_prefetch=1,               # `index` lands in SMEM
        grid=(B,),                           # one sample (row) per grid step
        in_specs=[
            pl.BlockSpec((1, 1, C), lambda i, idx: (i, 0, 0)),        # logits row i
            pl.BlockSpec((1, 1, cls), lambda i, idx: (idx[i], 0, 0)), # ema[index[i]]
        ],
        out_specs=(
            pl.BlockSpec((1, 1, cls), lambda i, idx: (idx[i], 0, 0)), # scatter row
            pl.BlockSpec((1, 1, 1), lambda i, idx: (i, 0, 0)),        # loss partial
        ),
    )

    new_ema3, terms = pl.pallas_call(
        functools.partial(_elr_row_kernel, beta=float(beta)),
        grid_spec=grid_spec,
        out_shape=(
            jax.ShapeDtypeStruct((num, 1, cls), jnp.float32),  # updated ema table
            jax.ShapeDtypeStruct((B, 1, 1), jnp.float32),      # per-row log-terms
        ),
        # Operand order at call time: (index, logits3, ema3) -> ema3 is operand 2.
        # Aliasing it to output 0 means rows not hit by `index` keep their old
        # values and the (num, cls) table is never copied inside the kernel call.
        input_output_aliases={2: 0},
        compiler_params=pltpu.CompilerParams(
            dimension_semantics=("parallel",)),  # 2-TC sharding on v7x; safe for
                                                 # unique indices (dups are
                                                 # nondeterministic, as in torch).
    )(index, logits3, ema3)

    new_ema = new_ema3.reshape(num, cls)
    final_loss = lamb * jnp.mean(terms)
    return new_ema, final_loss


def _elr_loss_reference(ema, index, outputs, *, beta, lamb):
    """Pure-JAX reference mirroring the PyTorch forward exactly."""
    y_pred = jax.nn.softmax(outputs.astype(jnp.float32), axis=1)
    y_pred = jnp.clip(y_pred, 0.0001, 1.0 - 0.0001)
    y_det = y_pred
    rows = beta * ema[index] + (1.0 - beta) * (
        y_det / jnp.sum(y_det, axis=1, keepdims=True))
    new_ema = ema.at[index].set(rows)
    elr_reg = jnp.mean(jnp.log(1.0 - jnp.sum(rows * y_pred, axis=1)))
    return new_ema, lamb * elr_reg


if __name__ == "__main__":
    # ELR_loss(beta=0.7, lamb=3.0, num=32, cls=128, device=...)
    beta, lamb = 0.7, 3.0
    num, cls = 32, 128     # cls=128 keeps the class dim lane-dense on TPU
    batch = 8

    key = jax.random.PRNGKey(0)
    k1, k2, k3 = jax.random.split(key, 3)

    # Non-zero ema so the beta*ema term matters; unique sample indices (the
    # duplicate-index case is nondeterministic, same as the PyTorch in-place set).
    ema = 0.1 * jax.random.uniform(k1, (num, cls), dtype=jnp.float32)
    outputs = jax.random.normal(k2, (batch, cls), dtype=jnp.float32)
    index = jax.random.permutation(k3, num)[:batch]

    # Reference first (kernel aliases its own ema operand internally).
    ref_ema, ref_loss = _elr_loss_reference(ema, index, outputs, beta=beta, lamb=lamb)

    fwd = jax.jit(functools.partial(elr_loss_forward, beta=beta, lamb=lamb))
    new_ema, loss = fwd(ema, index, outputs)
    jax.block_until_ready((new_ema, loss))

    assert jnp.allclose(loss, ref_loss, rtol=1e-5, atol=1e-6)
    assert jnp.allclose(new_ema, ref_ema, rtol=1e-5, atol=1e-6)

    print("KERNEL_OK")
</pallas_src>

<mosaic_0001>
module attributes {stable_mosaic.version = 11 : i64} {
  func.func @_elr_row_kernel(%arg0: i32, %arg1: memref<8xi32, #tpu.memory_space<smem>>, %arg2: memref<1x1x128xf32, #tpu.memory_space<vmem>>, %arg3: memref<1x1x128xf32, #tpu.memory_space<vmem>>, %arg4: memref<1x1x128xf32, #tpu.memory_space<vmem>>, %arg5: memref<1x1x1xf32, #tpu.memory_space<vmem>>) attributes {dimension_semantics = [#tpu.dimension_semantics<parallel>], iteration_bounds = array<i64: 8>, scalar_prefetch = 1 : i64, scratch_operands = 0 : i64, tpu.core_type = #tpu.core_type<tc>, window_params = [{transform_indices = @transform_0, window_bounds = array<i64: 1, 1, 128>}, {transform_indices = @transform_1, window_bounds = array<i64: 1, 1, 128>}, {transform_indices = @transform_2, window_bounds = array<i64: 1, 1, 128>}, {transform_indices = @transform_3, window_bounds = array<i64: 1, 1, 1>}]} {
    %c0 = arith.constant 0 : index
    %c0_0 = arith.constant 0 : index
    %c0_1 = arith.constant 0 : index
    %0 = vector.load %arg2[%c0, %c0_0, %c0_1] : memref<1x1x128xf32, #tpu.memory_space<vmem>>, vector<1x1x128xf32>
    %c0_2 = arith.constant 0 : index
    %c0_3 = arith.constant 0 : index
    %c0_4 = arith.constant 0 : index
    %1 = vector.load %arg3[%c0_2, %c0_3, %c0_4] : memref<1x1x128xf32, #tpu.memory_space<vmem>>, vector<1x1x128xf32>
    %cst = arith.constant dense<0xFF800000> : vector<1x1xf32>
    %2 = vector.multi_reduction <maximumf>, %0, %cst [2] : vector<1x1x128xf32> to vector<1x1xf32>
    %3 = vector.shape_cast %2 : vector<1x1xf32> to vector<1x1x1xf32>
    %4 = vector.broadcast %3 : vector<1x1x1xf32> to vector<1x1x128xf32>
    %5 = arith.subf %0, %4 : vector<1x1x128xf32>
    %6 = math.exp %5 : vector<1x1x128xf32>
    %cst_5 = arith.constant dense<0.000000e+00> : vector<1x1xf32>
    %7 = vector.multi_reduction <add>, %6, %cst_5 [2] : vector<1x1x128xf32> to vector<1x1xf32>
    %8 = vector.shape_cast %7 : vector<1x1xf32> to vector<1x1x1xf32>
    %9 = vector.broadcast %8 : vector<1x1x1xf32> to vector<1x1x128xf32>
    %10 = arith.divf %6, %9 : vector<1x1x128xf32>
    %cst_6 = arith.constant 9.99999974E-5 : f32
    %cst_7 = arith.constant 0.999899983 : f32
    %11 = vector.broadcast %cst_6 : f32 to vector<1x1x128xf32>
    %12 = arith.maximumf %11, %10 : vector<1x1x128xf32>
    %13 = vector.broadcast %cst_7 : f32 to vector<1x1x128xf32>
    %14 = arith.minimumf %13, %12 : vector<1x1x128xf32>
    %cst_8 = arith.constant dense<0.000000e+00> : vector<1x1xf32>
    %15 = vector.multi_reduction <add>, %14, %cst_8 [2] : vector<1x1x128xf32> to vector<1x1xf32>
    %16 = vector.shape_cast %15 : vector<1x1xf32> to vector<1x1x1xf32>
    %17 = vector.broadcast %16 : vector<1x1x1xf32> to vector<1x1x128xf32>
    %18 = arith.divf %14, %17 : vector<1x1x128xf32>
    %cst_9 = arith.constant 0.699999988 : f32
    %19 = vector.broadcast %cst_9 : f32 to vector<1x1x128xf32>
    %20 = arith.mulf %19, %1 : vector<1x1x128xf32>
    %cst_10 = arith.constant 3.000000e-01 : f32
    %21 = vector.broadcast %cst_10 : f32 to vector<1x1x128xf32>
    %22 = arith.mulf %21, %18 : vector<1x1x128xf32>
    %23 = arith.addf %20, %22 : vector<1x1x128xf32>
    %c0_11 = arith.constant 0 : index
    %c0_12 = arith.constant 0 : index
    %c0_13 = arith.constant 0 : index
    %24 = vector.load %arg4[%c0_11, %c0_12, %c0_13] : memref<1x1x128xf32, #tpu.memory_space<vmem>>, vector<1x1x128xf32>
    tpu.vector_store %arg4[%c0_11, %c0_12, %c0_13], %23 {strides = array<i32>} : memref<1x1x128xf32, #tpu.memory_space<vmem>>, vector<1x1x128xf32>,
    %25 = arith.mulf %23, %14 : vector<1x1x128xf32>
    %cst_14 = arith.constant dense<0.000000e+00> : vector<1x1xf32>
    %26 = vector.multi_reduction <add>, %25, %cst_14 [2] : vector<1x1x128xf32> to vector<1x1xf32>
    %27 = vector.shape_cast %26 : vector<1x1xf32> to vector<1x1x1xf32>
    %cst_15 = arith.constant 1.000000e+00 : f32
    %28 = vector.broadcast %cst_15 : f32 to vector<1x1x1xf32>
    %29 = arith.subf %28, %27 : vector<1x1x1xf32>
    %30 = math.log %29 : vector<1x1x1xf32>
    %c0_16 = arith.constant 0 : index
    %c0_17 = arith.constant 0 : index
    %c0_18 = arith.constant 0 : index
    %31 = vector.load %arg5[%c0_16, %c0_17, %c0_18] : memref<1x1x1xf32, #tpu.memory_space<vmem>>, vector<1x1x1xf32>
    tpu.vector_store %arg5[%c0_16, %c0_17, %c0_18], %30 {strides = array<i32>} : memref<1x1x1xf32, #tpu.memory_space<vmem>>, vector<1x1x1xf32>,
    return
  }
  func.func @transform_0(%arg0: i32, %arg1: memref<8xi32, #tpu.memory_space<smem>>) -> (i32, i32, i32) {
    %c0_i32 = arith.constant 0 : i32
    %c0_i32_0 = arith.constant 0 : i32
    %c0_i32_1 = arith.constant 0 : i32
    return %arg0, %c0_i32, %c0_i32_0 : i32, i32, i32
  }
  func.func @transform_1(%arg0: i32, %arg1: memref<8xi32, #tpu.memory_space<smem>>) -> (i32, i32, i32) {
    %0 = arith.index_cast %arg0 : i32 to index
    %1 = memref.load %arg1[%0] : memref<8xi32, #tpu.memory_space<smem>>
    %c0_i32 = arith.constant 0 : i32
    %c0_i32_0 = arith.constant 0 : i32
    %c0_i32_1 = arith.constant 0 : i32
    return %1, %c0_i32, %c0_i32_0 : i32, i32, i32
  }
  func.func @transform_2(%arg0: i32, %arg1: memref<8xi32, #tpu.memory_space<smem>>) -> (i32, i32, i32) {
    %0 = arith.index_cast %arg0 : i32 to index
    %1 = memref.load %arg1[%0] : memref<8xi32, #tpu.memory_space<smem>>
    %c0_i32 = arith.constant 0 : i32
    %c0_i32_0 = arith.constant 0 : i32
    %c0_i32_1 = arith.constant 0 : i32
    return %1, %c0_i32, %c0_i32_0 : i32, i32, i32
  }
  func.func @transform_3(%arg0: i32, %arg1: memref<8xi32, #tpu.memory_space<smem>>) -> (i32, i32, i32) {
    %c0_i32 = arith.constant 0 : i32
    %c0_i32_0 = arith.constant 0 : i32
    %c0_i32_1 = arith.constant 0 : i32
    return %arg0, %c0_i32, %c0_i32_0 : i32, i32, i32
  }
}

</mosaic_0001>

<bundles_post_ra>
// kernel: elr_loss_forward.1
= control target key start
LH: loop header
LB: loop body
LE: loop exit
PB: predicated region body
PF: predicated region fallthrough
CT: control target
= control target key end

     0   :  { %s392_s18 = smov [#allocation3]   ;;  %s458_s0 = inlined_call_operand.vmem [shape: s32[8], index: 0, kind: input, shape index: {}]   ;;  %s459_s1 = inlined_call_operand.vmem [shape: f32[8,1,128], index: 1, kind: input, shape index: {}]   ;;  %s460_s2 = inlined_call_operand.vmem [shape: f32[32,1,128], index: 2, kind: input, shape index: {}, may-alias: {2,3}]   ;;  %s461_s3 = inlined_call_operand.vmem [shape: f32[32,1,128], index: 3, kind: output, shape index: {0}, may-alias: {2,3}]   ;;  %s462_s4 = inlined_call_operand.vmem [shape: f32[8,1,1], index: 4, kind: output, shape index: {1}]  }
   0x1   :  { %s11_s17 = sshll.u32 %s458_s0, 4  ;;  %s12_s17 = int_to_ptr.vmem [resolvable:$true] %s11_s17 }
   0x2   :  { %14 = dma.vmem_to_smem %s12_s17, 16, %s392_s18, [#allocation2] }
   0x3   :  { %386 = dma.done.wait [#allocation2], 16 }
   0x4   :  { %387 = vsyncadd [#allocation2], 4294967280 }
   0x5   :  { %17 = sfence }
   0x6   :  { %s421_s19 = smov 0  }
   0x7 LB: > { %s427_s20 = sadd.s32 4294967295, %s390_s19   ;;  %p350_p0 = scmp.ge.s32.totalorder %s390_s19, 1  ;;  %s390_s19 = sphi %s421_s19, %s23_s19  }
   0x8   : > { %p161_p1 = scmp.lt.s32.totalorder %s390_s19, 9 }
   0xa   : > { %p162_p2 = pnand %p350_p0, %p161_p1 }
   0xb   : > { %p189_p3 = scmp.lt.s32.totalorder (!%p162_p2), %s427_s20, 7  ;;  %s192_s24 = sld [smem:[#allocation3 + %s427_s20]] (!%p162_p2) }
   0xc   : > { %165 = sbr.rel (%p162_p2) target bundleno = 560 (0x230), region = 28  ;;  %s197_s25 = sld [smem:[#allocation3 + %s427_s20]] (!%p162_p2) }
  0x11   : > { %s433_s0 = scalar_select %p189_p3, %s427_s20, 7  ;;  %vm207_vm0 = vcmask 1040384   ;;  %vm263_vm9 = vcmask 0  }
  0x12   : > { %p193_p4 = scmp.lt.s32.totalorder %s192_s24, 31  ;;  %p198_p5 = scmp.lt.s32.totalorder %s197_s25, 31 }
  0x13   : > { %s191_s23 = scalar_lea.vmem %s459_s1, %s433_s0  ;;  %s204_s8 = scalar_lea.vmem %s462_s4, %s433_s0 }
  0x14   : > { %v205_v0 = vld [vmem:[%s191_s23] sm:$0x1]  ;;  %s464_s24 = smov (!%p193_p4, %s192_s24), 31  ;;  %s466_s25 = smov (!%p198_p5, %s197_s25), 31 }
  0x15   : > { %v208_v1 = vsel %vm207_vm0, %v205_v0, -inf  ;;  %s195_s28 = scalar_lea.vmem %s460_s2, %s464_s24  ;;  %s200_s5 = scalar_lea.vmem %s461_s3, %s466_s25 }
  0x16   : > { %209 = vmax.xlane.f32.xlu0 %v208_v1  ;;  %v206_v31 = vld [vmem:[%s195_s28] sm:$0x1] }
  0x17   : > { %v252_v35 = vmul.f32 0.7, %v206_v31 }
  0x89   : > { %v210_v2 = vpop.xlane.xlu0 %209 }
  0x8a   : > { %v211_v3 = vsub.f32 %v205_v0, %v210_v2 }
  0x8c   : > { %v212_v4 = vmul.f32 1.442695, %v211_v3 }
  0x8e   : > { %362 = vpow2.f32 %v212_v4 }
  0x94   : > { %v363_v5 = vpop.eup %362 }
  0x95   : > { %v214_v6 = vsel %vm207_vm0, %v363_v5, 0.0 }
  0x96   : > { %215 = vadd.xlane.f32.xlu0 %v214_v6 }
 0x109   : > { %v216_v7 = vpop.xlane.xlu0 %215 }
 0x10a   : > { %364 = vrcp.f32 %v216_v7  ;;  %v228_v11 = vand.u32 2147483648, %v216_v7  ;;  %v226_v13 = vand.u32 2147483647, %v216_v7  ;;  %vm222_vm2 = vweird.f32 %v216_v7 }
 0x10c   : > { %v229_v15 = vor.u32 1.1754944e-38, %v228_v11  ;;  %vm227_vm4 = vcmp.eq.f32.partialorder %v226_v13, 8.507059e+37 }
 0x110   : > { %v365_v8 = vpop.eup %364 }
 0x111   : > { %v218_v9 = vmul.f32 %v365_v8, %v216_v7  ;;  %vm223_vm1 = vweird.f32 %v365_v8 }
 0x112   : > { %vm224_vm3 = vmor %vm222_vm2, %vm223_vm1 }
 0x113   : > { %v219_v10 = vsub.f32 1.0, %v218_v9 }
 0x115   : > { %v220_v12 = vmul.f32 %v365_v8, %v219_v10 }
 0x117   : > { %v221_v14 = vadd.f32 %v365_v8, %v220_v12 }
 0x119   : > { %v225_v16 = vsel %vm224_vm3, %v365_v8, %v221_v14 }
 0x11a   : > { %v230_v17 = vsel %vm227_vm4, %v229_v15, %v225_v16 }
 0x11b   : > { %v231_v18 = vmul.f32 %v363_v5, %v230_v17 }
 0x11d   : > { %v232_v19 = vmax.f32 %v231_v18, 0.0001 }
 0x11f   : > { %v233_v20 = vmin.f32 %v232_v19, 0.9999 }
 0x121   : > { %v234_v21 = vsel %vm207_vm0, %v233_v20, 0.0 }
 0x122   : > { %235 = vadd.xlane.f32.xlu1 %v234_v21 }
 0x195   : > { %v236_v22 = vpop.xlane.xlu1 %235 }
 0x196   : > { %366 = vrcp.f32 %v236_v22  ;;  %v248_v26 = vand.u32 2147483648, %v236_v22  ;;  %v246_v28 = vand.u32 2147483647, %v236_v22  ;;  %vm242_vm6 = vweird.f32 %v236_v22 }
 0x198   : > { %v249_v30 = vor.u32 1.1754944e-38, %v248_v26  ;;  %vm247_vm8 = vcmp.eq.f32.partialorder %v246_v28, 8.507059e+37 }
 0x19c   : > { %v367_v23 = vpop.eup %366 }
 0x19d   : > { %v238_v24 = vmul.f32 %v367_v23, %v236_v22  ;;  %vm243_vm5 = vweird.f32 %v367_v23 }
 0x19e   : > { %vm244_vm7 = vmor %vm242_vm6, %vm243_vm5 }
 0x19f   : > { %v239_v25 = vsub.f32 1.0, %v238_v24 }
 0x1a1   : > { %v240_v27 = vmul.f32 %v367_v23, %v239_v25 }
 0x1a3   : > { %v241_v29 = vadd.f32 %v367_v23, %v240_v27 }
 0x1a5   : > { %v245_v32 = vsel %vm244_vm7, %v367_v23, %v241_v29 }
 0x1a6   : > { %v250_v33 = vsel %vm247_vm8, %v249_v30, %v245_v32 }
 0x1a7   : > { %v251_v34 = vmul.f32 %v250_v33, %v233_v20 }
 0x1a9   : > { %v253_v36 = vmul.f32 0.3, %v251_v34 }
 0x1ab   : > { %v254_v37 = vadd.f32 %v253_v36, %v252_v35 }
 0x1ad   : > { %v256_v38 = vmul.f32 %v254_v37, %v233_v20  ;;  %255 = vst [vmem:[%s200_s5] sm:$0x1] %v254_v37 }
 0x1af   : > { %v257_v39 = vsel %vm207_vm0, %v256_v38, 0.0 }
 0x1b0   : > { %258 = vadd.xlane.f32.xlu1 %v257_v39 }
 0x223   : > { %v259_v40 = vpop.xlane.xlu1 %258 }
 0x224   : > { %v260_v41 = vsub.f32 1.0, %v259_v40 }
 0x226   : > { %368 = vlog2.f32 %v260_v41 }
 0x22c   : > { %v369_v42 = vpop.eup %368 }
 0x22d   : > { %v262_v43 = vmul.f32 0.6931472, %v369_v42 }
 0x22f   : > { %264 = vst.msk [vmem:[%s204_s8] sm:$0x1] %vm263_vm9, %v262_v43 }
 0x230 PF: > { %s23_s19 = sadd.s32 1, %s390_s19  }
 0x231   : > { %p20_p6 = scmp.ge.s32.totalorder %s23_s19, 10  }
 0x233   :  { %22 = sbr.rel (!%p20_p6) target bundleno = 7 (0x7), region = 73 }

</bundles_post_ra>
